<compile_context>
chip_gen: v7x
topology: tpu7x:2x2x1
jax: 0.10.0
libtpu: 0.0.40
codegen_flags: <defaults>
</compile_context>

<pallas_src>
import functools

import jax
import jax.numpy as jnp
import numpy as np
from jax.experimental import pallas as pl
from jax.experimental.pallas import tpu as pltpu

# Fixed (non-trainable) Sobel kernels, identical to the PyTorch module's init.
SOBEL_Y = np.array([[1.0, 2.0, 1.0],
                    [0.0, 0.0, 0.0],
                    [-1.0, -2.0, -1.0]], dtype=np.float32)
SOBEL_X = SOBEL_Y.T
# Combined filter SOBEL_X + SOBEL_Y = [[2,2,0],[2,0,-2],[0,-2,-2]]  (6 taps, all +-2):
#   out[i,j] = 2*( x[i-1,j-1] + x[i-1,j] + x[i,j-1] - x[i,j+1] - x[i+1,j] - x[i+1,j+1] )
# with zero padding outside the image.


def _sobel_kernel(x_ref, m_ref, o_ref, *, w, hw):
    # x_ref: (c_blk, H*W) input tile  (per-channel image flattened into the lane axis)
    # m_ref: (4,     H*W) f32 boundary multipliers [left, right, top, bottom]
    # o_ref: (c_blk, H*W) output tile
    xv = x_ref[...].astype(jnp.float32)

    m_l = m_ref[0:1, :]   # 0.0 where col == 0     (left neighbour is zero pad)
    m_r = m_ref[1:2, :]   # 0.0 where col == W-1   (right neighbour is zero pad)
    m_t = m_ref[2:3, :]   # 0.0 where row == 0     (upper neighbours are zero pad)
    m_b = m_ref[3:4, :]   # 0.0 where row == H-1   (lower neighbours are zero pad)

    # All shifts are static, non-negative lane rolls; wrapped lanes coincide exactly with
    # the zero-padding positions and are killed by the masks. Rolls go to the XLU slot,
    # the adds/muls to the VPU — both hide under the HBM DMA for this mem-bound kernel.
    xl = pltpu.roll(xv, 1, 1) * m_l                # x[i, j-1]
    xr = pltpu.roll(xv, hw - 1, 1) * m_r           # x[i, j+1]   (roll by -1)
    top = pltpu.roll(xl + xv, w, 1) * m_t          # x[i-1, j-1] + x[i-1, j]
    bot = pltpu.roll(xv + xr, hw - w, 1) * m_b     # x[i+1, j]   + x[i+1, j+1]

    o_ref[...] = (2.0 * (top + (xl - xr) - bot)).astype(o_ref.dtype)


def _choose_block(nc: int, hw: int, itemsize: int, target_bytes: int = 4 << 20) -> int:
    """Largest multiple-of-8 divisor of nc with tile <= ~4 MiB (amortizes the ~0.35us/step
    grid overhead; fits 2x in + 2x out double buffers under a 32 MiB VMEM limit on every
    generation). Prefer >= 2 grid steps when nc allows so v7x's 2 TensorCores both get work.
    No artificial '>= 4 steps' clamp."""
    if nc % 8 != 0:
        # Full first dim is always a legal block (no (8,128) sublane constraint).
        # TODO(synk): a huge, non-8-divisible N*C would need spatial tiling (halo seams).
        return nc
    per_ch = hw * itemsize
    cap = max(8, target_bytes // per_ch)
    c_blk = 8
    for d in range(8, nc + 1, 8):
        if nc % d == 0 and d <= cap:
            c_blk = d
    if c_blk == nc and nc >= 16:
        # Split into >= 2 steps for v7x megacore sharding.
        for d in range(nc // 2, 7, -1):
            if nc % d == 0 and d % 8 == 0:
                c_blk = d
                break
    return c_blk


def sobel_edge_detector(x: jax.Array) -> jax.Array:
    """x: (N, C, H, W) float32 -> (N, C, H, W) float32 (edge_x + edge_y)."""
    n, c, h, w = x.shape
    nc, hw = n * c, h * w
    xr = x.reshape(nc, hw)   # contiguous reshape: no data movement, lane-dense last dim

    # Boundary multipliers, computed once on host (no in-kernel integer mod).
    col = np.arange(hw) % w
    row = np.arange(hw) // w
    masks = jnp.asarray(np.stack([(col != 0),
                                  (col != w - 1),
                                  (row != 0),
                                  (row != h - 1)]).astype(np.float32))   # (4, hw)

    c_blk = _choose_block(nc, hw, x.dtype.itemsize)
    grid = (nc // c_blk,)

    out = pl.pallas_call(
        functools.partial(_sobel_kernel, w=w, hw=hw),
        out_shape=jax.ShapeDtypeStruct((nc, hw), x.dtype),
        grid_spec=pltpu.PrefetchScalarGridSpec(
            num_scalar_prefetch=0,
            grid=grid,
            in_specs=[
                pl.BlockSpec((c_blk, hw), lambda i: (i, 0)),
                pl.BlockSpec((4, hw), lambda i: (0, 0)),
            ],
            out_specs=pl.BlockSpec((c_blk, hw), lambda i: (i, 0)),
        ),
        compiler_params=pltpu.CompilerParams(
            dimension_semantics=("parallel",),          # shards across v7x's 2 TCs
            vmem_limit_bytes=32 * 1024 * 1024,          # covers 2x in + 2x out buffers
        ),
        cost_estimate=pl.CostEstimate(
            flops=6 * nc * hw,                          # 5 add/sub + 1 mul per element
            transcendentals=0,
            bytes_accessed=2 * x.size * x.dtype.itemsize,  # read x once, write out once
        ),
    )(xr, masks)
    return out.reshape(n, c, h, w)


def _reference(x: jax.Array) -> jax.Array:
    """Pure-JAX reference: combined (SOBEL_X + SOBEL_Y) cross-correlation, zero padding."""
    n, c, h, w = x.shape
    comb = SOBEL_X + SOBEL_Y
    xp = jnp.pad(x, ((0, 0), (0, 0), (1, 1), (1, 1)))
    acc = jnp.zeros_like(x)
    for di in range(3):
        for dj in range(3):
            wgt = float(comb[di, dj])
            if wgt != 0.0:
                acc = acc + wgt * xp[:, :, di:di + h, dj:dj + w]
    return acc


if __name__ == "__main__":
    key = jax.random.PRNGKey(0)
    N, C, H, W = 2, 4, 16, 16
    x = jax.random.normal(key, (N, C, H, W), dtype=jnp.float32)

    out = jax.block_until_ready(sobel_edge_detector(x))

    ref = _reference(x)
    assert out.shape == (N, C, H, W)
    assert jnp.allclose(out, ref, atol=1e-5, rtol=1e-5)
    print("KERNEL_OK")
</pallas_src>

<mosaic_0001>
module attributes {stable_mosaic.version = 11 : i64} {
  func.func @_sobel_kernel(%arg0: i32, %arg1: memref<8x256xf32, #tpu.memory_space<vmem>>, %arg2: memref<4x256xf32, #tpu.memory_space<vmem>>, %arg3: memref<8x256xf32, #tpu.memory_space<vmem>>) attributes {dimension_semantics = [#tpu.dimension_semantics<parallel>], iteration_bounds = array<i64: 1>, scalar_prefetch = 0 : i64, scratch_operands = 0 : i64, tpu.core_type = #tpu.core_type<tc>, window_params = [{transform_indices = @transform_0, window_bounds = array<i64: 8, 256>}, {pipeline_mode = #tpu.pipeline_mode<synchronous>, transform_indices = @transform_1, window_bounds = array<i64: 4, 256>}, {transform_indices = @transform_2, window_bounds = array<i64: 8, 256>}]} {
    %c0 = arith.constant 0 : index
    %c0_0 = arith.constant 0 : index
    %0 = vector.load %arg1[%c0, %c0_0] : memref<8x256xf32, #tpu.memory_space<vmem>>, vector<8x256xf32>
    %c0_1 = arith.constant 0 : index
    %c0_2 = arith.constant 0 : index
    %1 = vector.load %arg2[%c0_1, %c0_2] : memref<4x256xf32, #tpu.memory_space<vmem>>, vector<1x256xf32>
    %c1 = arith.constant 1 : index
    %c0_3 = arith.constant 0 : index
    %2 = vector.load %arg2[%c1, %c0_3] : memref<4x256xf32, #tpu.memory_space<vmem>>, vector<1x256xf32>
    %c2 = arith.constant 2 : index
    %c0_4 = arith.constant 0 : index
    %3 = vector.load %arg2[%c2, %c0_4] : memref<4x256xf32, #tpu.memory_space<vmem>>, vector<1x256xf32>
    %c3 = arith.constant 3 : index
    %c0_5 = arith.constant 0 : index
    %4 = vector.load %arg2[%c3, %c0_5] : memref<4x256xf32, #tpu.memory_space<vmem>>, vector<1x256xf32>
    %c1_i32 = arith.constant 1 : i32
    %5 = tpu.dynamic_rotate %0 by %c1_i32 dim 1 : vector<8x256xf32>, i32 -> vector<8x256xf32>
    %6 = vector.broadcast %1 : vector<1x256xf32> to vector<8x256xf32>
    %7 = arith.mulf %5, %6 : vector<8x256xf32>
    %c255_i32 = arith.constant 255 : i32
    %8 = tpu.dynamic_rotate %0 by %c255_i32 dim 1 : vector<8x256xf32>, i32 -> vector<8x256xf32>
    %9 = vector.broadcast %2 : vector<1x256xf32> to vector<8x256xf32>
    %10 = arith.mulf %8, %9 : vector<8x256xf32>
    %11 = arith.addf %7, %0 : vector<8x256xf32>
    %c16_i32 = arith.constant 16 : i32
    %12 = tpu.dynamic_rotate %11 by %c16_i32 dim 1 : vector<8x256xf32>, i32 -> vector<8x256xf32>
    %13 = vector.broadcast %3 : vector<1x256xf32> to vector<8x256xf32>
    %14 = arith.mulf %12, %13 : vector<8x256xf32>
    %15 = arith.addf %0, %10 : vector<8x256xf32>
    %c240_i32 = arith.constant 240 : i32
    %16 = tpu.dynamic_rotate %15 by %c240_i32 dim 1 : vector<8x256xf32>, i32 -> vector<8x256xf32>
    %17 = vector.broadcast %4 : vector<1x256xf32> to vector<8x256xf32>
    %18 = arith.mulf %16, %17 : vector<8x256xf32>
    %19 = arith.subf %7, %10 : vector<8x256xf32>
    %20 = arith.addf %14, %19 : vector<8x256xf32>
    %21 = arith.subf %20, %18 : vector<8x256xf32>
    %cst = arith.constant 2.000000e+00 : f32
    %22 = vector.broadcast %cst : f32 to vector<8x256xf32>
    %23 = arith.mulf %22, %21 : vector<8x256xf32>
    %c0_6 = arith.constant 0 : index
    %c0_7 = arith.constant 0 : index
    %24 = vector.load %arg3[%c0_6, %c0_7] : memref<8x256xf32, #tpu.memory_space<vmem>>, vector<8x256xf32>
    tpu.vector_store %arg3[%c0_6, %c0_7], %23 {strides = array<i32>} : memref<8x256xf32, #tpu.memory_space<vmem>>, vector<8x256xf32>,
    return
  }
  func.func @transform_0(%arg0: i32) -> (i32, i32) {
    %c0_i32 = arith.constant 0 : i32
    %c0_i32_0 = arith.constant 0 : i32
    return %arg0, %c0_i32 : i32, i32
  }
  func.func @transform_1(%arg0: i32) -> (i32, i32) {
    %c0_i32 = arith.constant 0 : i32
    %c0_i32_0 = arith.constant 0 : i32
    %c0_i32_1 = arith.constant 0 : i32
    return %c0_i32, %c0_i32_0 : i32, i32
  }
  func.func @transform_2(%arg0: i32) -> (i32, i32) {
    %c0_i32 = arith.constant 0 : i32
    %c0_i32_0 = arith.constant 0 : i32
    return %arg0, %c0_i32 : i32, i32
  }
}

</mosaic_0001>

<bundles_post_ra>
// kernel: tpu_custom_call.1
= control target key start
LH: loop header
LB: loop body
LE: loop exit
PB: predicated region body
PF: predicated region fallthrough
CT: control target
= control target key end

     0   :  { %7 = vsyncpa [#allocation3], 0  ;;  %s294_s0 = inlined_call_operand.hbm [shape: f32[8,256], index: 0, kind: input, shape index: {}]   ;;  %s295_s1 = inlined_call_operand.hbm [shape: f32[4,256], index: 1, kind: input, shape index: {}]   ;;  %s296_s2 = inlined_call_operand.hbm [shape: f32[8,256], index: 2, kind: output, shape index: {}]  }
   0x1   :  { %8 = vsyncpa [#allocation6], 0 }
   0x2   :  { %9 = vsyncpa [#allocation4], 0  ;;  %s236_s9 = smov [#allocation2]   ;;  %s237_s11 = smov [#allocation5]  }
   0x3   :  { %s16_s10 = sshll.u32 %s236_s9, 4  ;;  %s26_s12 = sshll.u32 %s237_s11, 4  ;;  %s17_s10 = int_to_ptr.vmem [resolvable:$true] %s16_s10  ;;  %s27_s12 = int_to_ptr.vmem [resolvable:$true] %s26_s12 }
   0x4   :  { %s164_s15 = scalar_lea.hbm %s294_s0, 256 }
   0x5   :  { %p165_p0 = scmp.ne.s32.totalorder %s294_s0, %s164_s15  ;;  %p168_p1 = scmp.lt.u32.totalorder %s164_s15, %s294_s0 }
   0x7   :  { %p170_p2 = pnand %p168_p1, %p165_p0 }
   0x9   :  { %173 = shalt.err (!%p170_p2)
}
   0xa   :  { %s174_s20 = scalar_lea.vmem %s17_s10, 256  ;;  %p179_p4 = scmp.lt.s32.totalorder %s17_s10, %s17_s10 }
   0xb   :  { %p175_p3 = scmp.ne.s32.totalorder %s17_s10, %s174_s20  ;;  %p180_p5 = scmp.lt.s32.totalorder %s174_s20, %s174_s20 }
   0xd   :  { %p181_p6 = por %p180_p5, %p179_p4 }
   0xf   :  { %p182_p7 = pnand %p181_p6, %p175_p3 }
  0x11   :  { %185 = shalt.err (!%p182_p7)
}
  0x12   :  { %19 = dma.hbm_to_vmem [thread:$0]  %s294_s0, 256, %s17_s10, [#allocation3]  }
  0x13   :  { %s186_s25 = scalar_lea.hbm %s295_s1, 128 }
  0x14   :  { %p187_p8 = scmp.ne.s32.totalorder %s295_s1, %s186_s25  ;;  %p190_p9 = scmp.lt.u32.totalorder %s186_s25, %s295_s1 }
  0x16   :  { %p192_p10 = pnand %p190_p9, %p187_p8 }
  0x18   :  { %195 = shalt.err (!%p192_p10)
}
  0x19   :  { %s196_s30 = scalar_lea.vmem %s27_s12, 128  ;;  %p201_p12 = scmp.lt.s32.totalorder %s27_s12, %s27_s12 }
  0x1a   :  { %p197_p11 = scmp.ne.s32.totalorder %s27_s12, %s196_s30  ;;  %p202_p13 = scmp.lt.s32.totalorder %s196_s30, %s196_s30 }
  0x1c   :  { %p203_p0 = por %p202_p13, %p201_p12 }
  0x1e   :  { %p204_p1 = pnand %p203_p0, %p197_p11 }
  0x20   :  { %207 = shalt.err (!%p204_p1)
}
  0x21   :  { %29 = dma.hbm_to_vmem [thread:$0]  %s295_s1, 128, %s27_s12, [#allocation6]  }
  0x22   :  { %230 = dma.done.wait [#allocation3], 256  }
  0x23   :  { %231 = vsyncadd [#allocation3], 4294967040 }
  0x24   :  { %232 = dma.done.wait [#allocation6], 128  }
  0x25   :  { %233 = vsyncadd [#allocation6], 4294967168  ;;  %v36_v0 = vld [vmem:[#allocation2] sm:$0xff]  ;;  %s238_s4 = smov 127   ;;  %s239_s5 = smov 1   ;;  %v37_v1 = vld [vmem:[#allocation2 + $0x8] sm:$0xff]  ;;  %v49_v2 = vlaneseq }
  0x26   :  { %67 = vrot.lane.b32.xlu1 %v36_v0, %s238_s4  ;;  %45 = vrot.lane.b32.xlu0 %v36_v0, %s239_s5  ;;  %v40_v7 = vld [vmem:[#allocation5 + $0x1] ss:$4 sm:$0x3]  ;;  %v38_v8 = vld [vmem:[#allocation5] ss:$4 sm:$0x3] }
  0x27   :  { %v56_v3 = vshrl.u32 %v49_v2, 7  ;;  %v50_v4 = vand.u32 127, %v49_v2  ;;  %s240_s1 = smov 16   ;;  %s241_s6 = smov 112  }
  0x28   :  { %v42_v31 = vld [vmem:[#allocation5 + $0x2] ss:$4 sm:$0x3]  ;;  %v44_v34 = vld [vmem:[#allocation5 + $0x3] ss:$4 sm:$0x3] }
  0x29   :  { %v57_v5 = vsub.s32 0, %v56_v3  ;;  %v61_v6 = vsub.s32 1, %v56_v3  ;;  %vm71_vm0 = vcmp.lt.s32.totalorder %v50_v4, 127  ;;  %vm51_vm1 = vcmp.lt.s32.totalorder %v50_v4, 1  ;;  %s242_s7 = smov [#allocation7]  }
  0x2a   :  { %69 = vrot.lane.b32.xlu1 %v37_v1, %s238_s4  ;;  %47 = vrot.lane.b32.xlu0 %v37_v1, %s239_s5  ;;  %vm93_vm2 = vcmp.lt.s32.totalorder %v50_v4, 16  ;;  %vm115_vm3 = vcmp.lt.s32.totalorder %v50_v4, 112  ;;  %s147_s8 = sshll.u32 %s242_s7, 4  ;;  %s148_s8 = int_to_ptr.vmem [resolvable:$true] %s147_s8 }
  0x2b   :  { %v78_v11 = vrot.slane %v40_v7, %v57_v5  ;;  %v82_v12 = vrot.slane %v40_v7, %v61_v6  ;;  %v58_v13 = vrot.slane %v38_v8, %v57_v5  ;;  %v62_v14 = vrot.slane %v38_v8, %v61_v6  ;;  %s208_s9 = scalar_lea.vmem %s148_s8, 256  ;;  %p213_p3 = scmp.lt.s32.totalorder %s148_s8, %s148_s8 }
  0x2c   :  { %v100_v32 = vrot.slane %v42_v31, %v57_v5  ;;  %v104_v33 = vrot.slane %v42_v31, %v61_v6  ;;  %v122_v41 = vrot.slane %v44_v34, %v57_v5  ;;  %v126_v42 = vrot.slane %v44_v34, %v61_v6  ;;  %p209_p2 = scmp.ne.s32.totalorder %s148_s8, %s208_s9  ;;  %p214_p4 = scmp.lt.s32.totalorder %s208_s9, %s208_s9 }
  0x2e   :  { %p215_p5 = por %p214_p4, %p213_p3 }
  0x30   :  { %p216_p6 = pnand %p215_p5, %p209_p2 }
  0x98   :  { %v68_v9 = vpop.permute.xlu1 %67  ;;  %v46_v10 = vpop.permute.xlu0 %45 }
  0x9c   :  { %v70_v15 = vpop.permute.xlu1 %69  ;;  %v48_v16 = vpop.permute.xlu0 %47 }
  0x9d   :  { %v72_v17 = vsel %vm71_vm0, %v68_v9, %v70_v15  ;;  %v73_v18 = vsel %vm71_vm0, %v70_v15, %v68_v9  ;;  %v52_v19 = vsel %vm51_vm1, %v46_v10, %v48_v16  ;;  %v53_v20 = vsel %vm51_vm1, %v48_v16, %v46_v10 }
  0x9e   :  { %v85_v21 = vmul.f32 %v78_v11, %v72_v17  ;;  %v86_v22 = vmul.f32 %v82_v12, %v73_v18  ;;  %v65_v23 = vmul.f32 %v58_v13, %v53_v20  ;;  %v66_v24 = vmul.f32 %v62_v14, %v52_v19 }
  0xa0   :  { %v131_v25 = vsub.f32 %v65_v23, %v85_v21  ;;  %v132_v26 = vsub.f32 %v66_v24, %v86_v22  ;;  %v87_v27 = vadd.f32 %v65_v23, %v36_v0  ;;  %v88_v28 = vadd.f32 %v66_v24, %v37_v1 }
  0xa1   :  { %v109_v29 = vadd.f32 %v85_v21, %v36_v0  ;;  %v110_v30 = vadd.f32 %v86_v22, %v37_v1 }
  0xa2   :  { %89 = vrot.lane.b32.xlu0 %v87_v27, %s240_s1  ;;  %91 = vrot.lane.b32.xlu1 %v88_v28, %s240_s1 }
  0xa6   :  { %111 = vrot.lane.b32.xlu0 %v109_v29, %s241_s6  ;;  %113 = vrot.lane.b32.xlu1 %v110_v30, %s241_s6 }
 0x114   :  { %v90_v35 = vpop.permute.xlu0 %89  ;;  %v92_v36 = vpop.permute.xlu1 %91 }
 0x115   :  { %v94_v37 = vsel %vm93_vm2, %v90_v35, %v92_v36  ;;  %v95_v38 = vsel %vm93_vm2, %v92_v36, %v90_v35 }
 0x116   :  { %v107_v39 = vmul.f32 %v100_v32, %v95_v38  ;;  %v108_v40 = vmul.f32 %v104_v33, %v94_v37 }
 0x118   :  { %v112_v43 = vpop.permute.xlu0 %111  ;;  %v114_v44 = vpop.permute.xlu1 %113  ;;  %v133_v47 = vadd.f32 %v131_v25, %v107_v39  ;;  %v134_v48 = vadd.f32 %v132_v26, %v108_v40 }
 0x119   :  { %v116_v45 = vsel %vm115_vm3, %v112_v43, %v114_v44  ;;  %v117_v46 = vsel %vm115_vm3, %v114_v44, %v112_v43 }
 0x11a   :  { %v129_v49 = vmul.f32 %v122_v41, %v116_v45  ;;  %v130_v50 = vmul.f32 %v126_v42, %v117_v46 }
 0x11c   :  { %v135_v51 = vsub.f32 %v133_v47, %v129_v49  ;;  %v136_v52 = vsub.f32 %v134_v48, %v130_v50 }
 0x11e   :  { %v137_v53 = vmul.f32 2.0, %v135_v51  ;;  %v138_v54 = vmul.f32 2.0, %v136_v52 }
 0x120   :  { %139 = vst [vmem:[#allocation7] sm:$0xff] %v137_v53  ;;  %140 = vst [vmem:[#allocation7 + $0x8] sm:$0xff] %v138_v54 }
 0x121   :  { %219 = shalt.err (!%p216_p6)
}
 0x122   :  { %s220_s12 = scalar_lea.hbm %s296_s2, 256 }
 0x123   :  { %p221_p7 = scmp.ne.s32.totalorder %s296_s2, %s220_s12  ;;  %p224_p8 = scmp.lt.u32.totalorder %s220_s12, %s296_s2 }
 0x125   :  { %p226_p9 = pnand %p224_p8, %p221_p7 }
 0x127   :  { %229 = shalt.err (!%p226_p9)
}
 0x128   :  { %150 = dma.vmem_to_hbm [thread:$0]  %s148_s8, 256, %s296_s2, [#allocation4]  }
 0x129   :  { %234 = dma.done.wait [#allocation4], 256  }
 0x12a   :  { %235 = vsyncadd [#allocation4], 4294967040 }
 0x12b   :  { %154 = vsyncpa [#allocation3], 1 }
 0x12c   :  { %155 = vsyncpa [#allocation6], 1 }
 0x12d   :  { %156 = vsyncpa [#allocation4], 1 }

</bundles_post_ra>
